<compile_context>
chip_gen: v6e
topology: v6e:2x2x1
jax: 0.10.0
libtpu: 0.0.40
codegen_flags: <defaults>
</compile_context>

<pallas_src>
import math
import functools

import jax
import jax.numpy as jnp
from jax import lax
from jax.experimental import pallas as pl
from jax.experimental.pallas import tpu as pltpu

# Make the XLA-side reference matmuls use the accurate f32 path.
jax.config.update("jax_default_matmul_precision", "highest")


# ----------------------------------------------------------------------------
# Per-generation tiling constants (v5e/v6e: 128 MiB VMEM, v7x: 64 MiB per TC)
# ----------------------------------------------------------------------------
def _vmem_capacity_bytes():
    try:
        info = pltpu.get_tpu_info()
        for name in ("vmem_capacity_bytes", "vmem_bytes", "vmem_size_bytes"):
            v = getattr(info, name, None)
            if v:
                return int(v)
    except Exception:
        pass
    return 64 * 1024 * 1024  # conservative fallback (v7x per-TC VMEM)


_VMEM_CAP = _vmem_capacity_bytes()
_BIG_VMEM = _VMEM_CAP >= 96 * 1024 * 1024
_VMEM_LIMIT = (96 if _BIG_VMEM else 48) * 1024 * 1024
_TILE_M = 512 if _BIG_VMEM else 256     # row tile for the linear kernels
_TILE_Q = 256 if _BIG_VMEM else 128     # query tile for the attention kernel


def _pick_tk(K):
    """K-reduction tile: full K when small, else a 128-multiple divisor."""
    if K <= 2048:
        return K
    for cand in (2048, 1024, 512, 256, 128):
        if K % cand == 0:
            return cand
    return K


# ----------------------------------------------------------------------------
# Pallas kernels
# ----------------------------------------------------------------------------
def _linear_kernel(x_ref, w_ref, b_ref, o_ref, acc_ref, *, compute_dtype):
    # y = x @ W + b     x:(1,tm,tk) W:(1,tk,N) b:(1,1,N)  acc:(tm,N) f32
    k_idx = pl.program_id(2)

    @pl.when(k_idx == 0)
    def _():
        acc_ref[...] = jnp.zeros_like(acc_ref)

    x = x_ref[0].astype(compute_dtype)   # no-op when activations already bf16
    w = w_ref[0].astype(compute_dtype)
    acc_ref[...] += jnp.dot(x, w, preferred_element_type=jnp.float32)

    @pl.when(k_idx == pl.num_programs(2) - 1)
    def _():
        o_ref[0] = (acc_ref[...] + b_ref[0].astype(jnp.float32)).astype(o_ref.dtype)


def stacked_linear(x, w, b, *, compute_dtype, out_dtype=None):
    """y[g] = x[g] @ w[g or 0] + b[g or 0].

    x: (G, M, K)   w: (GW, K, N) with GW in {1, G}   b: (GW, N)   -> (G, M, N)

    Tiled over M (pipeline overlaps DMA with MXU work) and over K with an f32
    VMEM accumulator (so cr*d-wide fused conv weights never need a single
    resident block — v7x 64 MiB guard).  Weight/bias BlockSpecs are constant
    over the M axis so they stay resident across row tiles.
    """
    G, M, K = x.shape
    GW, K2, N = w.shape
    assert K2 == K and GW in (1, G)
    if out_dtype is None:
        out_dtype = x.dtype
    b = b.reshape(GW, 1, N)

    tm = M if M <= _TILE_M else _TILE_M
    tk = _pick_tk(K)
    grid = (G, pl.cdiv(M, tm), pl.cdiv(K, tk))

    if GW > 1:
        w_idx = lambda g, i, k: (g, k, 0)
        b_idx = lambda g, i, k: (g, 0, 0)
    else:
        w_idx = lambda g, i, k: (0, k, 0)
        b_idx = lambda g, i, k: (0, 0, 0)

    kern = functools.partial(_linear_kernel, compute_dtype=compute_dtype)
    return pl.pallas_call(
        kern,
        out_shape=jax.ShapeDtypeStruct((G, M, N), out_dtype),
        grid=grid,
        in_specs=[
            pl.BlockSpec((1, tm, tk), lambda g, i, k: (g, i, k)),
            pl.BlockSpec((1, tk, N), w_idx),
            pl.BlockSpec((1, 1, N), b_idx),
        ],
        out_specs=pl.BlockSpec((1, tm, N), lambda g, i, k: (g, i, 0)),
        scratch_shapes=[pltpu.VMEM((tm, N), jnp.float32)],
        compiler_params=pltpu.CompilerParams(
            dimension_semantics=("parallel", "parallel", "arbitrary"),
            vmem_limit_bytes=_VMEM_LIMIT,
        ),
    )(x, w, b)


def _attn_kernel(q_ref, kv_ref, o_ref, *, h, d_k, cf, compute_dtype, approx_recip):
    # q:(1,tq,D)  kv:(2,1,C,D)  out:(1,tq,D); heads live in the lane dim.
    tq = q_ref.shape[1]
    C = kv_ref.shape[2]
    row0 = pl.program_id(1) * tq

    # Causal compression mask built in-kernel: query i may attend compressed
    # key j iff j <= i // cf  <=>  j * cf <= i   (integer-mul only, no div).
    rows = lax.broadcasted_iota(jnp.int32, (tq, C), 0) + row0
    cols = lax.broadcasted_iota(jnp.int32, (tq, C), 1)
    allowed = (cols * cf) <= rows

    q_all = q_ref[0]           # (tq, D)   (1/sqrt(d_k) already folded into W_q)
    k_all = kv_ref[0, 0]       # (C,  D)
    v_all = kv_ref[1, 0]       # (C,  D)

    outs = []
    for hh in range(h):
        sl = slice(hh * d_k, (hh + 1) * d_k)
        qh = q_all[:, sl].astype(compute_dtype)   # no-op when inputs are bf16
        kh = k_all[:, sl].astype(compute_dtype)
        vh = v_all[:, sl].astype(compute_dtype)

        # Contract last dims directly (no k.T materialized).
        s = lax.dot_general(qh, kh, (((1,), (1,)), ((), ())),
                            preferred_element_type=jnp.float32)   # (tq, C)
        s = jnp.where(allowed, s, jnp.float32(-1000000000.0))     # masked_fill
        s = s - jnp.max(s, axis=-1, keepdims=True)                # stable softmax
        p = jnp.exp(s)
        p = p * pl.reciprocal(jnp.sum(p, axis=-1, keepdims=True),
                              approx=approx_recip)
        # TODO(synk): dropout on p omitted (eval-mode identity).
        outs.append(jnp.dot(p.astype(compute_dtype), vh,
                            preferred_element_type=jnp.float32))  # (tq, d_k)

    # Single lane-dense, full-D, unmasked store per query tile.
    o_ref[0] = jnp.concatenate(outs, axis=-1).astype(o_ref.dtype)


def attention(q, kv, *, h, d_k, cf, compute_dtype, out_dtype=None):
    """Masked multi-head attention. q:(B,L,D) kv:(2,B,C,D) -> (B,L,D)."""
    B, L, D = q.shape
    C = kv.shape[2]
    if out_dtype is None:
        out_dtype = q.dtype
    tq = L if L <= _TILE_Q else _TILE_Q
    approx = jnp.dtype(compute_dtype) != jnp.dtype(jnp.float32)
    kern = functools.partial(_attn_kernel, h=h, d_k=d_k, cf=cf,
                             compute_dtype=compute_dtype, approx_recip=approx)
    return pl.pallas_call(
        kern,
        out_shape=jax.ShapeDtypeStruct((B, L, D), out_dtype),
        grid=(B, pl.cdiv(L, tq)),
        in_specs=[
            pl.BlockSpec((1, tq, D), lambda bi, qi: (bi, qi, 0)),
            # K and V arrive stacked in one block; the index_map is constant
            # over the query-tile axis so the block stays resident per batch
            # (no refetch across qi); bf16 activations halve its footprint.
            # TODO(synk): for very large C*D on v7x, switch to an inner
            # flash-style tile over C instead of full-C residency.
            pl.BlockSpec((2, 1, C, D), lambda bi, qi: (0, bi, 0, 0)),
        ],
        out_specs=pl.BlockSpec((1, tq, D), lambda bi, qi: (bi, qi, 0)),
        compiler_params=pltpu.CompilerParams(
            dimension_semantics=("parallel", "parallel"),
            vmem_limit_bytes=_VMEM_LIMIT,
        ),
    )(q, kv)


# ----------------------------------------------------------------------------
# Parameters (deterministic, PyTorch-style uniform fan-in init)
# ----------------------------------------------------------------------------
def init_params(key, d_model, cr):
    ks = jax.random.split(key, 10)

    def unif(k, shape, fan_in):
        bound = 1.0 / math.sqrt(fan_in)
        return jax.random.uniform(k, shape, jnp.float32, -bound, bound)

    params = {
        # MemoryCompress ≡ Conv1d(d_model, d_model, kernel_size=cr, stride=cr)
        "comp_w": unif(ks[0], (d_model, d_model, cr), d_model * cr),  # (out,in,k)
        "comp_b": unif(ks[1], (d_model,), d_model * cr),
    }
    for n in range(4):  # q, k, v, out projectors, stored as (in, out)
        params[f"w{n}"] = unif(ks[2 + 2 * n], (d_model, d_model), d_model)
        params[f"b{n}"] = unif(ks[3 + 2 * n], (d_model,), d_model)
    return params


def prepare_params(params, d_model, h):
    """One-time constant folding on the weights (done once, outside the hot path).

    * 1/sqrt(d_k) folded into the Q projection.
    * MemoryCompress conv fused with the K/V projections:
        (x @ Wc + bc) @ Wp + bp == x @ (Wc @ Wp) + (bc @ Wp + bp)
    """
    d_k = d_model // h
    scale = 1.0 / math.sqrt(d_k)
    cr = params["comp_w"].shape[-1]
    wc = jnp.transpose(params["comp_w"], (2, 1, 0)).reshape(cr * d_model, d_model)
    return {
        "wq": params["w0"] * scale,
        "bq": params["b0"] * scale,
        "wkv": jnp.stack([wc @ params["w1"], wc @ params["w2"]]),          # (2,cr*d,d)
        "bkv": jnp.stack([params["comp_b"] @ params["w1"] + params["b1"],
                          params["comp_b"] @ params["w2"] + params["b2"]]),  # (2,d)
        "wo": params["w3"],
        "bo": params["b3"],
    }


# ----------------------------------------------------------------------------
# Forward pass (glue in JAX, hot ops in Pallas)
# ----------------------------------------------------------------------------
def memory_compressed_attention(fused, query, key, value, *, h, cr,
                                compute_dtype=jnp.bfloat16):
    b, l, d = query.shape
    d_k = d // h
    act_dtype = compute_dtype  # bf16 intermediates on the throughput path

    # Stack K/V ONCE, before pad/reshape, so window flattening is one XLA copy.
    kv = jnp.stack([key, value])                                   # (2,B,L,D)
    padding = cr - l % cr
    if padding < cr:  # matches F.pad(t, (0, 0, padding, 0)): front-pad the seq
        kv = jnp.pad(kv, ((0, 0), (0, 0), (padding, 0), (0, 0)))
    l_pad = kv.shape[2]
    comp = l_pad // cr
    cf = math.ceil(l / comp)

    # Fused compression-conv + K/V projection on the raw flattened windows.
    kv_windows = kv.reshape(2, b * comp, cr * d).astype(act_dtype)  # (2,BC,cr*d)
    kv_p = stacked_linear(kv_windows,
                          fused["wkv"].astype(act_dtype), fused["bkv"],
                          compute_dtype=compute_dtype, out_dtype=act_dtype)  # (2,BC,d)

    # Q projection (scale already folded into the weights).
    q_p = stacked_linear(query.reshape(1, b * l, d).astype(act_dtype),
                         fused["wq"][None].astype(act_dtype), fused["bq"][None],
                         compute_dtype=compute_dtype, out_dtype=act_dtype)[0]

    # No head split/merge transposes and no K/V un-stacking: the attention
    # kernel consumes (B,L,D) + stacked (2,B,C,D) directly and slices heads
    # from the lane dimension.
    q_h = q_p.reshape(b, l, d)
    kv_h = kv_p.reshape(2, b, comp, d)

    x = attention(q_h, kv_h, h=h, d_k=d_k, cf=cf,
                  compute_dtype=compute_dtype, out_dtype=act_dtype)  # (b,l,d)

    out = stacked_linear(x.reshape(1, b * l, d),
                         fused["wo"][None].astype(act_dtype), fused["bo"][None],
                         compute_dtype=compute_dtype, out_dtype=query.dtype)[0]
    return out.reshape(b, l, d)


# ----------------------------------------------------------------------------
# Pure-JAX reference (same math, no Pallas) for a correctness check
# ----------------------------------------------------------------------------
def _compress_mask(l, comp):
    """(seq, comp) bool: True where query i may attend compressed key j."""
    cf = math.ceil(l / comp)
    tri = jnp.arange(comp)[None, :] > jnp.arange(comp)[:, None]  # triu, k=1
    blocked = jnp.repeat(tri, cf, axis=0)[:l]                    # row-replicate cf×
    return jnp.logical_not(blocked)


def reference(params, query, key, value, *, h, cr):
    b, l, d = query.shape
    d_k = d // h
    padding = cr - l % cr
    if padding < cr:
        key = jnp.pad(key, ((0, 0), (padding, 0), (0, 0)))
        value = jnp.pad(value, ((0, 0), (padding, 0), (0, 0)))
    comp = key.shape[1] // cr
    wc = jnp.transpose(params["comp_w"], (2, 1, 0)).reshape(cr * d, d)
    key_c = key.reshape(b, comp, cr * d) @ wc + params["comp_b"]
    value_c = value.reshape(b, comp, cr * d) @ wc + params["comp_b"]
    allowed = _compress_mask(l, comp)

    q_p = (query @ params["w0"] + params["b0"]).reshape(b, l, h, d_k).transpose(0, 2, 1, 3)
    k_p = (key_c @ params["w1"] + params["b1"]).reshape(b, comp, h, d_k).transpose(0, 2, 1, 3)
    v_p = (value_c @ params["w2"] + params["b2"]).reshape(b, comp, h, d_k).transpose(0, 2, 1, 3)

    s = jnp.einsum("bhqd,bhkd->bhqk", q_p, k_p) / math.sqrt(d_k)
    s = jnp.where(allowed[None, None], s, -1000000000.0)
    p = jax.nn.softmax(s, axis=-1)
    x = jnp.einsum("bhqk,bhkd->bhqd", p, v_p)
    x = x.transpose(0, 2, 1, 3).reshape(b, l, d)
    return x @ params["w3"] + params["b3"]


if __name__ == "__main__":
    b, l, d_model, h, cr = 2, 8, 32, 4, 3

    root = jax.random.PRNGKey(0)
    kp, kq, kk, kv = jax.random.split(root, 4)
    params = init_params(kp, d_model, cr)
    q = jax.random.normal(kq, (b, l, d_model), jnp.float32)
    k = jax.random.normal(kk, (b, l, d_model), jnp.float32)
    v = jax.random.normal(kv, (b, l, d_model), jnp.float32)

    ref = reference(params, q, k, v, h=h, cr=cr)
    fused = prepare_params(params, d_model, h)

    # f32 MXU path (exact reciprocal): strict check against the JAX reference.
    out = memory_compressed_attention(fused, q, k, v, h=h, cr=cr,
                                      compute_dtype=jnp.float32)
    out = jax.block_until_ready(out)
    assert out.shape == (b, l, d_model), out.shape
    assert bool(jnp.all(jnp.isfinite(out)))
    assert bool(jnp.allclose(out, ref, atol=2e-3, rtol=2e-3)), (
        float(jnp.max(jnp.abs(out - ref)))
    )

    # bf16 throughput path (bf16 activations between kernels, f32 accumulation
    # and softmax inside kernels, approx EUP reciprocal): looser check.
    out_bf16 = memory_compressed_attention(fused, q, k, v, h=h, cr=cr,
                                           compute_dtype=jnp.bfloat16)
    out_bf16 = jax.block_until_ready(out_bf16)
    assert out_bf16.shape == (b, l, d_model)
    assert bool(jnp.all(jnp.isfinite(out_bf16)))
    assert bool(jnp.allclose(out_bf16, ref, atol=3e-2, rtol=3e-2)), (
        float(jnp.max(jnp.abs(out_bf16 - ref)))
    )

    print("KERNEL_OK")
</pallas_src>

<mosaic_0001>
module attributes {stable_mosaic.version = 11 : i64} {
  func.func @_linear_kernel(%arg0: i32, %arg1: i32, %arg2: i32, %arg3: memref<1x6x96xf32, #tpu.memory_space<vmem>>, %arg4: memref<1x96x32xf32, #tpu.memory_space<vmem>>, %arg5: memref<1x1x32xf32, #tpu.memory_space<vmem>>, %arg6: memref<1x6x32xf32, #tpu.memory_space<vmem>>, %arg7: memref<6x32xf32, #tpu.memory_space<vmem>>) attributes {dimension_semantics = [#tpu.dimension_semantics<parallel>, #tpu.dimension_semantics<parallel>, #tpu.dimension_semantics<arbitrary>], iteration_bounds = array<i64: 2, 1, 1>, scalar_prefetch = 0 : i64, scratch_operands = 1 : i64, tpu.core_type = #tpu.core_type<tc>, window_params = [{transform_indices = @transform_0, window_bounds = array<i64: 1, 6, 96>}, {transform_indices = @transform_1, window_bounds = array<i64: 1, 96, 32>}, {transform_indices = @transform_2, window_bounds = array<i64: 1, 1, 32>}, {transform_indices = @transform_3, window_bounds = array<i64: 1, 6, 32>}]} {
    %c0_i32 = arith.constant 0 : i32
    %0 = arith.cmpi eq, %arg2, %c0_i32 : i32
    %1 = arith.extui %0 : i1 to i32
    %c0_i32_0 = arith.constant 0 : i32
    %2 = arith.cmpi ne, %1, %c0_i32_0 : i32
    scf.if %2 {
      %cst_12 = arith.constant 0.000000e+00 : f32
      %14 = vector.broadcast %cst_12 : f32 to vector<6x32xf32>
      %c0_13 = arith.constant 0 : index
      %c0_14 = arith.constant 0 : index
      %15 = vector.load %arg7[%c0_13, %c0_14] : memref<6x32xf32, #tpu.memory_space<vmem>>, vector<6x32xf32>
      tpu.vector_store %arg7[%c0_13, %c0_14], %14 {strides = array<i32>} : memref<6x32xf32, #tpu.memory_space<vmem>>, vector<6x32xf32>,
    } else {
    }
    %c0 = arith.constant 0 : index
    %c0_1 = arith.constant 0 : index
    %c0_2 = arith.constant 0 : index
    %3 = vector.load %arg3[%c0, %c0_1, %c0_2] : memref<1x6x96xf32, #tpu.memory_space<vmem>>, vector<1x6x96xf32>
    %4 = vector.shape_cast %3 : vector<1x6x96xf32> to vector<6x96xf32>
    %c0_3 = arith.constant 0 : index
    %c0_4 = arith.constant 0 : index
    %c0_5 = arith.constant 0 : index
    %5 = vector.load %arg4[%c0_3, %c0_4, %c0_5] : memref<1x96x32xf32, #tpu.memory_space<vmem>>, vector<1x96x32xf32>
    %6 = vector.shape_cast %5 : vector<1x96x32xf32> to vector<96x32xf32>
    %c0_6 = arith.constant 0 : index
    %c0_7 = arith.constant 0 : index
    %7 = vector.load %arg7[%c0_6, %c0_7] : memref<6x32xf32, #tpu.memory_space<vmem>>, vector<6x32xf32>
    %cst = arith.constant dense<0.000000e+00> : vector<6x32xf32>
    %8 = tpu.matmul %4, %6, %cst {dimension_numbers = #tpu.dot_dimension_numbers<[1], [0], [0], [1], [0, 0, 1, 1], [], []>, precision = #tpu.contract_precision<fp32>} : vector<6x96xf32>, vector<96x32xf32>, vector<6x32xf32> -> vector<6x32xf32>
    %9 = arith.addf %7, %8 : vector<6x32xf32>
    %c0_8 = arith.constant 0 : index
    %c0_9 = arith.constant 0 : index
    %10 = vector.load %arg7[%c0_8, %c0_9] : memref<6x32xf32, #tpu.memory_space<vmem>>, vector<6x32xf32>
    tpu.vector_store %arg7[%c0_8, %c0_9], %9 {strides = array<i32>} : memref<6x32xf32, #tpu.memory_space<vmem>>, vector<6x32xf32>,
    %c0_i32_10 = arith.constant 0 : i32
    %11 = arith.cmpi eq, %arg2, %c0_i32_10 : i32
    %12 = arith.extui %11 : i1 to i32
    %c0_i32_11 = arith.constant 0 : i32
    %13 = arith.cmpi ne, %12, %c0_i32_11 : i32
    scf.if %13 {
      %c0_12 = arith.constant 0 : index
      %c0_13 = arith.constant 0 : index
      %14 = vector.load %arg7[%c0_12, %c0_13] : memref<6x32xf32, #tpu.memory_space<vmem>>, vector<6x32xf32>
      %c0_14 = arith.constant 0 : index
      %c0_15 = arith.constant 0 : index
      %c0_16 = arith.constant 0 : index
      %15 = vector.load %arg5[%c0_14, %c0_15, %c0_16] : memref<1x1x32xf32, #tpu.memory_space<vmem>>, vector<1x1x32xf32>
      %16 = vector.shape_cast %15 : vector<1x1x32xf32> to vector<1x32xf32>
      %17 = vector.broadcast %16 : vector<1x32xf32> to vector<6x32xf32>
      %18 = arith.addf %14, %17 : vector<6x32xf32>
      %c0_17 = arith.constant 0 : index
      %c0_18 = arith.constant 0 : index
      %c0_19 = arith.constant 0 : index
      %19 = vector.load %arg6[%c0_17, %c0_18, %c0_19] : memref<1x6x32xf32, #tpu.memory_space<vmem>>, vector<1x6x32xf32>
      %20 = vector.shape_cast %19 : vector<1x6x32xf32> to vector<6x32xf32>
      %21 = vector.shape_cast %18 : vector<6x32xf32> to vector<1x6x32xf32>
      tpu.vector_store %arg6[%c0_17, %c0_18, %c0_19], %21 {strides = array<i32>} : memref<1x6x32xf32, #tpu.memory_space<vmem>>, vector<1x6x32xf32>,
    } else {
    }
    return
  }
  func.func @transform_0(%arg0: i32, %arg1: i32, %arg2: i32) -> (i32, i32, i32) {
    %c0_i32 = arith.constant 0 : i32
    return %arg0, %arg1, %arg2 : i32, i32, i32
  }
  func.func @transform_1(%arg0: i32, %arg1: i32, %arg2: i32) -> (i32, i32, i32) {
    %c0_i32 = arith.constant 0 : i32
    %c0_i32_0 = arith.constant 0 : i32
    return %arg0, %arg2, %c0_i32 : i32, i32, i32
  }
  func.func @transform_2(%arg0: i32, %arg1: i32, %arg2: i32) -> (i32, i32, i32) {
    %c0_i32 = arith.constant 0 : i32
    %c0_i32_0 = arith.constant 0 : i32
    %c0_i32_1 = arith.constant 0 : i32
    return %arg0, %c0_i32, %c0_i32_0 : i32, i32, i32
  }
  func.func @transform_3(%arg0: i32, %arg1: i32, %arg2: i32) -> (i32, i32, i32) {
    %c0_i32 = arith.constant 0 : i32
    %c0_i32_0 = arith.constant 0 : i32
    return %arg0, %arg1, %c0_i32 : i32, i32, i32
  }
}

</mosaic_0001>

<bundles_post_ra>
// kernel: tpu_custom_call.1
= control target key start
LH: loop header
LB: loop body
LE: loop exit
PB: predicated region body
PF: predicated region fallthrough
CT: control target
= control target key end

     0   :  { %s1325_s12 = smov 0   ;;  %s1327_s13 = smov 0   ;;  %s1671_s0 = inlined_call_operand.vmem [shape: f32[2,6,96], index: 0, kind: input, shape index: {}]   ;;  %s1672_s1 = inlined_call_operand.vmem [shape: f32[2,96,32], index: 1, kind: input, shape index: {}]   ;;  %s1673_s2 = inlined_call_operand.vmem [shape: f32[2,1,32], index: 2, kind: input, shape index: {}]   ;;  %s1674_s3 = inlined_call_operand.vmem [shape: f32[2,6,32], index: 3, kind: output, shape index: {}]  }
   0x1   :  { %s1329_s14 = smov 0  }
   0x2 LB: > { %s32_s15 = sadd.s32 1, %s1297_s13  ;;  %p1005_p0 = scmp.ge.s32.totalorder %s1301_s14, 1  ;;  %s1301_s14 = sphi %s1329_s14, %s13_s14   ;;  %s1297_s13 = sphi %s1327_s13, %s1676_s13   ;;  %s1293_s12 = sphi %s1325_s12, %s1675_s12  }
   0x3   : > { %p34_p1 = scmp.ge.s32.totalorder %s32_s15, 2  ;;  %p192_p2 = scmp.lt.s32.totalorder %s1301_s14, 3 }
   0x5   : > { %s1678_s15 = smov (%p34_p1, %s32_s15), 0  ;;  %p193_p3 = pnand %p1005_p0, %p192_p2 }
   0x6   : > { %p235_p4 = scmp.lt.s32.totalorder (!%p193_p3), %s1293_s12, 1 }
   0x7   : > { %196 = sbr.rel (%p193_p3) target bundleno = 310 (0x136), region = 32 }
   0xc   : > { %v1303_v0 = vmov 0.0   ;;  %s1680_s12 = smov (!%p235_p4, %s1293_s12), 1  ;;  %vm1304_vm0 = vmmov 0   ;;  %vm285_vm1 = vcmask 785408   ;;  %vm269_vm2 = vcmask 259072  }
   0xd   : > { %1090 = vmatprep.subr.mxu0 %v1303_v0  ;;  %1117 = vmatprep.subr.mxu1 %v1303_v0  ;;  %s1252_s16 = smul.u32 96, %s1680_s12  ;;  %s1006_s20 = sshll.u32 %s1680_s12, 3  ;;  %270 = vst.msk [vmem:[#allocation2] sm:$0x3f] %vm269_vm2, %v1303_v0 }
   0xe   : > { %1114 = vmatprep.mubr.msk.f32.mxu0 %vm1304_vm0, %v1303_v0  ;;  %1141 = vmatprep.mubr.msk.f32.mxu1 %vm1304_vm0, %v1303_v0  ;;  %s244_s23 = scalar_lea.vmem %s1671_s0, %s1006_s20  ;;  %s257_s26 = scalar_lea.vmem %s1673_s2, %s1680_s12 }
   0xf   : > { %s1355_s19 = scalar_lea.vmem %s1672_s1, %s1252_s16  ;;  %v271_v26 = vld [vmem:[%s244_s23] sm:$0x3f]  ;;  %s264_s29 = scalar_lea.vmem %s1674_s3, %s1006_s20 }
  0x10   : > { %v283_v1 = vld [vmem:[%s1355_s19 + $0x58] sm:$0xff]  ;;  %v282_v2 = vld [vmem:[%s1355_s19 + $0x50] sm:$0xff]  ;;  %v281_v3 = vld [vmem:[%s1355_s19 + $0x48] sm:$0xff]  ;;  %v287_v38 = vsel %vm285_vm1, %v271_v26, 0 }
  0x11   : > { %v1361_v4 = vand.u32 4294901760, %v283_v1  ;;  %v1363_v5 = vand.u32 4294901760, %v282_v2  ;;  %v1365_v6 = vand.u32 4294901760, %v281_v3  ;;  %v280_v7 = vld [vmem:[%s1355_s19 + $0x40] sm:$0xff]  ;;  %v279_v8 = vld [vmem:[%s1355_s19 + $0x38] sm:$0xff]  ;;  %v278_v9 = vld [vmem:[%s1355_s19 + $0x30] sm:$0xff] }
  0x12   : > { %v1370_v10 = vand.u32 4294901760, %v280_v7  ;;  %v1372_v11 = vand.u32 4294901760, %v279_v8  ;;  %v1374_v12 = vand.u32 4294901760, %v278_v9  ;;  %v277_v13 = vld [vmem:[%s1355_s19 + $0x28] sm:$0xff]  ;;  %v276_v14 = vld [vmem:[%s1355_s19 + $0x20] sm:$0xff]  ;;  %v275_v19 = vld [vmem:[%s1355_s19 + $0x18] sm:$0xff] }
  0x13   : > { %1091 = vmatpush3.msra.mxu0 %v1361_v4  ;;  %v1385_v15 = vsub.f32 %v283_v1, %v1361_v4  ;;  %v1388_v16 = vsub.f32 %v282_v2, %v1363_v5  ;;  %v1390_v17 = vand.u32 4294901760, %v277_v13  ;;  %v1393_v18 = vsub.f32 %v281_v3, %v1365_v6  ;;  %v274_v30 = vld [vmem:[%s1355_s19 + $0x10] sm:$0xff]  ;;  %v273_v35 = vld [vmem:[%s1355_s19 + $0x8] sm:$0xff]  ;;  %v272_v43 = vld [vmem:[%s1355_s19] sm:$0xff] }
  0x14   : > { %1092 = vmatprep.subr.mxu0 %v1303_v0  ;;  %v1398_v20 = vsub.f32 %v280_v7, %v1370_v10  ;;  %v1401_v21 = vsub.f32 %v279_v8, %v1372_v11  ;;  %v1407_v25 = vand.u32 4294901760, %v276_v14  ;;  %v1411_v28 = vand.u32 4294901760, %v275_v19 }
  0x15   : > { %1093 = vmatpush3.msra.mxu0 %v1363_v5  ;;  %v387_v22 = vand.u32 4294901760, %v1385_v15  ;;  %v394_v23 = vand.u32 4294901760, %v1388_v16  ;;  %v401_v24 = vand.u32 4294901760, %v1393_v18  ;;  %v1416_v31 = vsub.f32 %v278_v9, %v1374_v12 }
  0x16   : > { %1094 = vmatprep.subr.mxu0 %v1303_v0  ;;  %v408_v27 = vand.u32 4294901760, %v1398_v20  ;;  %v415_v29 = vand.u32 4294901760, %v1401_v21  ;;  %v1430_v36 = vsub.f32 %v277_v13, %v1390_v17  ;;  %v1438_v41 = vand.u32 4294901760, %v274_v30 }
  0x17   : > { %1095 = vmatpush3.msra.mxu0 %v1365_v6  ;;  %v388_v32 = vsub.f32 %v1385_v15, %v387_v22  ;;  %v395_v33 = vsub.f32 %v1388_v16, %v394_v23  ;;  %v402_v34 = vsub.f32 %v1393_v18, %v401_v24  ;;  %v422_v42 = vand.u32 4294901760, %v1416_v31 }
  0x18   : > { %1096 = vmatprep.subr.mxu0 %v1303_v0  ;;  %v409_v37 = vsub.f32 %v1398_v20, %v408_v27  ;;  %v416_v44 = vsub.f32 %v1401_v21, %v415_v29  ;;  %v1446_v45 = vand.u32 4294901760, %v273_v35  ;;  %v1449_v46 = vsub.f32 %v276_v14, %v1407_v25 }
  0x19   : > { %1097 = vmatpush3.msra.mxu0 %v1370_v10  ;;  %v389_v39 = vand.u32 4294901760, %v388_v32  ;;  %v396_v40 = vand.u32 4294901760, %v395_v33  ;;  %v403_v47 = vand.u32 4294901760, %v402_v34  ;;  %v429_v48 = vand.u32 4294901760, %v1430_v36 }
  0x1a   : > { %1098 = vmatprep.subr.mxu0 %v1303_v0  ;;  %v1453_v49 = vand.u32 4294901760, %v287_v38  ;;  %v1456_v50 = vsub.f32 %v275_v19, %v1411_v28  ;;  %v410_v51 = vand.u32 4294901760, %v409_v37  ;;  %v1460_v52 = vand.u32 4294901760, %v272_v43 }
  0x1b   : > { %1099 = vmatpush3.msra.mxu0 %v1372_v11  ;;  %1118 = vmatpush3.msra.mxu1 %v389_v39  ;;  %v423_v53 = vsub.f32 %v1416_v31, %v422_v42  ;;  %v436_v54 = vand.u32 4294901760, %v1449_v46  ;;  %v1471_v56 = vsub.f32 %v274_v30, %v1438_v41  ;;  %v417_v57 = vand.u32 4294901760, %v416_v44 }
  0x1c   : > { %1100 = vmatprep.subr.mxu0 %v1303_v0  ;;  %1119 = vmatprep.subr.mxu1 %v1303_v0  ;;  %v1468_v55 = vsub.f32 %v287_v38, %v1453_v49  ;;  %v430_v58 = vsub.f32 %v1430_v36, %v429_v48  ;;  %v443_v60 = vand.u32 4294901760, %v1456_v50  ;;  %v1482_v61 = vsub.f32 %v273_v35, %v1446_v45 }
  0x1d   : > { %1101 = vmatpush3.msra.mxu0 %v1374_v12  ;;  %1120 = vmatpush3.msra.mxu1 %v396_v40  ;;  %v424_v62 = vand.u32 4294901760, %v423_v53  ;;  %v437_v63 = vsub.f32 %v1449_v46, %v436_v54  ;;  %v450_v1 = vand.u32 4294901760, %v1471_v56  ;;  %v1492_v2 = vsub.f32 %v272_v43, %v1460_v52 }
  0x1e   : > { %1102 = vmatprep.subr.mxu0 %v1303_v0  ;;  %1121 = vmatprep.subr.mxu1 %v1303_v0  ;;  %v368_v59 = vand.u32 4294901760, %v1468_v55  ;;  %v431_v3 = vand.u32 4294901760, %v430_v58  ;;  %v444_v8 = vsub.f32 %v1456_v50, %v443_v60  ;;  %v457_v9 = vand.u32 4294901760, %v1482_v61 }
  0x1f   : > { %1103 = vmatpush3.msra.mxu0 %v1390_v17  ;;  %1122 = vmatpush3.msra.mxu1 %v403_v47  ;;  %v438_v13 = vand.u32 4294901760, %v437_v63  ;;  %v451_v14 = vsub.f32 %v1471_v56, %v450_v1  ;;  %v464_v19 = vand.u32 4294901760, %v1492_v2 }
  0x20   : > { %1104 = vmatprep.subr.mxu0 %v1303_v0  ;;  %1123 = vmatprep.subr.mxu1 %v1303_v0  ;;  %v369_v7 = vsub.f32 %v1468_v55, %v368_v59  ;;  %v445_v30 = vand.u32 4294901760, %v444_v8  ;;  %v458_v32 = vsub.f32 %v1482_v61, %v457_v9 }
  0x21   : > { %1105 = vmatpush3.msra.mxu0 %v1407_v25  ;;  %1124 = vmatpush3.msra.mxu1 %v410_v51  ;;  %v452_v33 = vand.u32 4294901760, %v451_v14  ;;  %v465_v34 = vsub.f32 %v1492_v2, %v464_v19 }
  0x22   : > { %1106 = vmatprep.subr.mxu0 %v1303_v0  ;;  %1125 = vmatprep.subr.mxu1 %v1303_v0  ;;  %v370_v26 = vand.u32 4294901760, %v369_v7  ;;  %v459_v35 = vand.u32 4294901760, %v458_v32 }
  0x23   : > { %1107 = vmatpush3.msra.mxu0 %v1411_v28  ;;  %1126 = vmatpush3.msra.mxu1 %v417_v57  ;;  %v466_v37 = vand.u32 4294901760, %v465_v34 }
  0x24   : > { %1108 = vmatprep.subr.mxu0 %v1303_v0  ;;  %1127 = vmatprep.subr.mxu1 %v1303_v0 }
  0x25   : > { %1109 = vmatpush3.msra.mxu0 %v1438_v41  ;;  %1128 = vmatpush3.msra.mxu1 %v424_v62 }
  0x26   : > { %1110 = vmatprep.subr.mxu0 %v1303_v0  ;;  %1129 = vmatprep.subr.mxu1 %v1303_v0 }
  0x27   : > { %1111 = vmatpush3.msra.mxu0 %v1446_v45  ;;  %1130 = vmatpush3.msra.mxu1 %v431_v3 }
  0x28   : > { %1112 = vmatprep.subr.mxu0 %v1303_v0  ;;  %1131 = vmatprep.subr.mxu1 %v1303_v0 }
  0x29   : > { %1113 = vmatpush3.msra.mxu0 %v1460_v52  ;;  %1132 = vmatpush3.msra.mxu1 %v438_v13 }
  0x2a   : > { %1133 = vmatprep.subr.mxu1 %v1303_v0  ;;  %1144 = vmatprep.subr.mxu0 %v1303_v0 }
  0x2b   : > { %1115 = vmatmul.mubr.f32.vlgmr.msra.gmra.mxu0 %v370_v26  ;;  %1134 = vmatpush3.msra.mxu1 %v445_v30 }
  0x2c   : > { %1145 = vmatpush3.msra.mxu0 %v1385_v15  ;;  %1135 = vmatprep.subr.mxu1 %v1303_v0 }
  0x2d   : > { %1146 = vmatprep.subr.mxu0 %v1303_v0  ;;  %1136 = vmatpush3.msra.mxu1 %v452_v33 }
  0x2e   : > { %1147 = vmatpush3.msra.mxu0 %v1388_v16  ;;  %1137 = vmatprep.subr.mxu1 %v1303_v0 }
  0x2f   : > { %1148 = vmatprep.subr.mxu0 %v1303_v0  ;;  %1138 = vmatpush3.msra.mxu1 %v459_v35 }
  0x30   : > { %1149 = vmatpush3.msra.mxu0 %v1393_v18  ;;  %1139 = vmatprep.subr.mxu1 %v1303_v0 }
  0x31   : > { %1150 = vmatprep.subr.mxu0 %v1303_v0  ;;  %1140 = vmatpush3.msra.mxu1 %v466_v37 }
  0x32   : > { %1151 = vmatpush3.msra.mxu0 %v1398_v20  ;;  %1142 = vmatmul.mubr.f32.vlgmr.msra.gmra.mxu1 %v1453_v49 }
  0x33   : > { %1152 = vmatprep.subr.mxu0 %v1303_v0  ;;  %1171 = vmatprep.subr.mxu1 %v1303_v0 }
  0x34   : > { %1153 = vmatpush3.msra.mxu0 %v1401_v21  ;;  %1172 = vmatpush3.msra.mxu1 %v1361_v4 }
  0x35   : > { %1154 = vmatprep.subr.mxu0 %v1303_v0  ;;  %1173 = vmatprep.subr.mxu1 %v1303_v0 }
  0x36   : > { %1155 = vmatpush3.msra.mxu0 %v1416_v31  ;;  %1174 = vmatpush3.msra.mxu1 %v1363_v5 }
  0x37   : > { %1156 = vmatprep.subr.mxu0 %v1303_v0  ;;  %1175 = vmatprep.subr.mxu1 %v1303_v0 }
  0x38   : > { %1157 = vmatpush3.msra.mxu0 %v1430_v36  ;;  %1176 = vmatpush3.msra.mxu1 %v1365_v6 }
  0x39   : > { %1158 = vmatprep.subr.mxu0 %v1303_v0  ;;  %1177 = vmatprep.subr.mxu1 %v1303_v0 }
  0x3a   : > { %1159 = vmatpush3.msra.mxu0 %v1449_v46  ;;  %1178 = vmatpush3.msra.mxu1 %v1370_v10 }
  0x3b   : > { %1160 = vmatprep.subr.mxu0 %v1303_v0  ;;  %1179 = vmatprep.subr.mxu1 %v1303_v0 }
  0x3c   : > { %1161 = vmatpush3.msra.mxu0 %v1456_v50  ;;  %1180 = vmatpush3.msra.mxu1 %v1372_v11 }
  0x3d   : > { %1162 = vmatprep.subr.mxu0 %v1303_v0  ;;  %1181 = vmatprep.subr.mxu1 %v1303_v0 }
  0x3e   : > { %1163 = vmatpush3.msra.mxu0 %v1471_v56  ;;  %1182 = vmatpush3.msra.mxu1 %v1374_v12 }
  0x3f   : > { %1164 = vmatprep.subr.mxu0 %v1303_v0  ;;  %1183 = vmatprep.subr.mxu1 %v1303_v0 }
  0x40   : > { %1165 = vmatpush3.msra.mxu0 %v1482_v61  ;;  %1184 = vmatpush3.msra.mxu1 %v1390_v17 }
  0x41   : > { %1166 = vmatprep.subr.mxu0 %v1303_v0  ;;  %1185 = vmatprep.subr.mxu1 %v1303_v0 }
  0x42   : > { %1167 = vmatpush3.msra.mxu0 %v1492_v2  ;;  %1168 = vmatprep.mubr.msk.f32.mxu0 %vm1304_vm0, %v1303_v0 }
  0x43   : > { %1186 = vmatpush3.msra.mxu1 %v1407_v25  ;;  %1169 = vmatmul.mubr.f32.vlgmr.msra.gmra.mxu0 %v1468_v55 }
  0x44   : > { %1187 = vmatprep.subr.mxu1 %v1303_v0  ;;  %1198 = vmatprep.subr.mxu0 %v1303_v0 }
  0x45   : > { %1188 = vmatpush3.msra.mxu1 %v1411_v28  ;;  %1199 = vmatpush3.msra.mxu0 %v387_v22 }
  0x46   : > { %1189 = vmatprep.subr.mxu1 %v1303_v0  ;;  %1200 = vmatprep.subr.mxu0 %v1303_v0 }
  0x47   : > { %1190 = vmatpush3.msra.mxu1 %v1438_v41  ;;  %1201 = vmatpush3.msra.mxu0 %v394_v23 }
  0x48   : > { %1191 = vmatprep.subr.mxu1 %v1303_v0  ;;  %1202 = vmatprep.subr.mxu0 %v1303_v0 }
  0x49   : > { %1192 = vmatpush3.msra.mxu1 %v1446_v45  ;;  %1203 = vmatpush3.msra.mxu0 %v401_v24  ;;  %v284_v24 = vld [vmem:[#allocation2] sm:$0x3f] }
  0x4a   : > { %1193 = vmatprep.subr.mxu1 %v1303_v0  ;;  %1204 = vmatprep.subr.mxu0 %v1303_v0 }
  0x4b   : > { %1194 = vmatpush3.msra.mxu1 %v1460_v52  ;;  %1195 = vmatprep.mubr.msk.f32.mxu1 %vm1304_vm0, %v1303_v0 }
  0x4c   : > { %1205 = vmatpush3.msra.mxu0 %v408_v27  ;;  %1196 = vmatmul.mubr.f32.vlgmr.msra.gmra.mxu1 %v368_v59 }
  0x4d   : > { %1206 = vmatprep.subr.mxu0 %v1303_v0  ;;  %1225 = vmatprep.subr.mxu1 %v1303_v0 }
  0x4e   : > { %1207 = vmatpush3.msra.mxu0 %v415_v29  ;;  %1226 = vmatpush3.msra.mxu1 %v1361_v4  ;;  %v1009_v29 = vld [vmem:[%s257_s26] ss:$0 sm:$0xff] }
  0x4f   : > { %1208 = vmatprep.subr.mxu0 %v1303_v0  ;;  %1227 = vmatprep.subr.mxu1 %v1303_v0 }
  0x50   : > { %1209 = vmatpush3.msra.mxu0 %v422_v42  ;;  %1228 = vmatpush3.msra.mxu1 %v1363_v5 }
  0x51   : > { %1210 = vmatprep.subr.mxu0 %v1303_v0  ;;  %1229 = vmatprep.subr.mxu1 %v1303_v0 }
  0x52   : > { %1211 = vmatpush3.msra.mxu0 %v429_v48  ;;  %1230 = vmatpush3.msra.mxu1 %v1365_v6 }
  0x53   : > { %1212 = vmatprep.subr.mxu0 %v1303_v0  ;;  %1231 = vmatprep.subr.mxu1 %v1303_v0 }
  0x54   : > { %1213 = vmatpush3.msra.mxu0 %v436_v54  ;;  %1232 = vmatpush3.msra.mxu1 %v1370_v10 }
  0x55   : > { %1214 = vmatprep.subr.mxu0 %v1303_v0  ;;  %1233 = vmatprep.subr.mxu1 %v1303_v0 }
  0x56   : > { %1215 = vmatpush3.msra.mxu0 %v443_v60  ;;  %1234 = vmatpush3.msra.mxu1 %v1372_v11 }
  0x57   : > { %1216 = vmatprep.subr.mxu0 %v1303_v0  ;;  %1235 = vmatprep.subr.mxu1 %v1303_v0 }
  0x58   : > { %1217 = vmatpush3.msra.mxu0 %v450_v1  ;;  %1236 = vmatpush3.msra.mxu1 %v1374_v12 }
  0x59   : > { %1218 = vmatprep.subr.mxu0 %v1303_v0  ;;  %1237 = vmatprep.subr.mxu1 %v1303_v0 }
  0x5a   : > { %1219 = vmatpush3.msra.mxu0 %v457_v9  ;;  %1238 = vmatpush3.msra.mxu1 %v1390_v17 }
  0x5b   : > { %1220 = vmatprep.subr.mxu0 %v1303_v0  ;;  %1239 = vmatprep.subr.mxu1 %v1303_v0 }
  0x5c   : > { %1221 = vmatpush3.msra.mxu0 %v464_v19  ;;  %1222 = vmatprep.mubr.msk.f32.mxu0 %vm1304_vm0, %v1303_v0 }
  0x5d   : > { %1240 = vmatpush3.msra.mxu1 %v1407_v25  ;;  %1223 = vmatmul.mubr.f32.vlgmr.msra.gmra.mxu0 %v1453_v49 }
  0x5e   : > { %1241 = vmatprep.subr.mxu1 %v1303_v0  ;;  %1249 = vmatprep.mubr.msk.f32.mxu1 %vm1304_vm0, %v1303_v0 }
  0x5f   : > { %1242 = vmatpush3.msra.mxu1 %v1411_v28 }
  0x60   : > { %1243 = vmatprep.subr.mxu1 %v1303_v0 }
  0x61   : > { %1244 = vmatpush3.msra.mxu1 %v1438_v41 }
  0x62   : > { %1245 = vmatprep.subr.mxu1 %v1303_v0 }
  0x63   : > { %1246 = vmatpush3.msra.mxu1 %v1446_v45 }
  0x64   : > { %1247 = vmatprep.subr.mxu1 %v1303_v0 }
  0x65   : > { %1248 = vmatpush3.msra.mxu1 %v1460_v52 }
  0x66   : > { %1250 = vmatmul.mubr.f32.vlgmr.msra.gmra.mxu1 %v1453_v49 }
  0xeb   : > { %v372_v4 = vpop.f32.mrf.mxu0 }
  0xed   : > { %v1116_v5 = vpop.f32.mrf.mxu0 }
  0xf2   : > { %v503_v6 = vpop.f32.mrf.mxu1 }
  0xf3   : > { %v504_v18 = vadd.f32 %v503_v6, %v372_v4 }
  0xf4   : > { %v1143_v10 = vpop.f32.mrf.mxu1 }
 0x103   : > { %v599_v11 = vpop.f32.mrf.mxu0 }
 0x104   : > { %v600_v21 = vadd.f32 %v599_v11, %v504_v18 }
 0x105   : > { %v1170_v12 = vpop.f32.mrf.mxu0 }
 0x10c   : > { %v684_v15 = vpop.f32.mrf.mxu1 }
 0x10d   : > { %v685_v22 = vadd.f32 %v684_v15, %v600_v21 }
 0x10e   : > { %v1197_v16 = vpop.f32.mrf.mxu1 }
 0x11d   : > { %v791_v17 = vpop.f32.mrf.mxu0 }
 0x11e   : > { %v792_v23 = vadd.f32 %v791_v17, %v685_v22 }
 0x11f   : > { %v1224_v20 = vpop.f32.mrf.mxu0 }
 0x126   : > { %v874_v25 = vpop.f32.mrf.mxu1 }
 0x127   : > { %v875_v27 = vadd.f32 %v874_v25, %v792_v23 }
 0x128   : > { %v1251_v0 = vpop.f32.mrf.mxu1 }
 0x129   : > { %v878_v28 = vadd.f32 %v875_v27, %v284_v24 }
 0x12b   : > { %880 = vst.msk [vmem:[#allocation2] sm:$0x3f] %vm269_vm2, %v878_v28 }
 0x132   : > { %v884_v31 = vld [vmem:[#allocation2] sm:$0x3f] }
 0x133   : > { %v892_v36 = vadd.f32 %v1009_v29, %v884_v31 }
 0x135   : > { %893 = vst.msk [vmem:[%s264_s29] sm:$0x3f] %vm269_vm2, %v892_v36 }
 0x136 PF: > { %s13_s14 = sadd.s32 1, %s1301_s14   ;;  %s1675_s12 = smov %s1297_s13 }
 0x137   : > { %p10_p5 = scmp.ge.s32.totalorder %s13_s14, 4   ;;  %s1676_s13 = smov %s1678_s15 }
 0x139   :  { %12 = sbr.rel (!%p10_p5) target bundleno = 2 (0x2), region = 76 }

</bundles_post_ra>
